<compile_context>
chip_gen: v7x
topology: tpu7x:2x2x1
jax: 0.10.0
libtpu: 0.0.40
codegen_flags: <defaults>
</compile_context>

<pallas_src>
import functools

import jax
import jax.numpy as jnp
from jax.experimental import pallas as pl
from jax.experimental.pallas import tpu as pltpu


def _round_up(n, m):
    return ((n + m - 1) // m) * m


def _location_kernel(x_ref, w_ref, o_ref, *, K, TT):
    # x_ref: (T + K - 1, C_in)  zero-padded, time-major input for one batch
    #        element (resident across all time tiles of that batch element).
    # w_ref: (K * C_in, D)      fused conv+dense weight (resident whole call).
    # o_ref: (TT, D)            lane-dense output tile.
    t0 = pl.program_id(1) * TT
    if TT % 8 == 0:
        t0 = pl.multiple_of(t0, 8)
    # Build the (TT, K*C_in) im2col panel in VMEM from K shifted windows of
    # the padded input (column order k*C_in + c matches w_fused row order).
    panel = jnp.concatenate(
        [x_ref[pl.ds(t0 + k, TT), :] for k in range(K)], axis=-1)
    acc = jnp.dot(panel, w_ref[...], preferred_element_type=jnp.float32)
    o_ref[...] = acc.astype(o_ref.dtype)


def location_layer_forward(x_bct, conv_w_fck, dense_w_df, *,
                           time_tile=2048, out_dtype=None):
    """x_bct: (B, 2, T) like the PyTorch NCW input. Returns (B, T, D)."""
    B, C_in, T = x_bct.shape
    F_, c_chk, K = conv_w_fck.shape
    assert c_chk == C_in
    D = dense_w_df.shape[0]
    assert K % 2 == 1, "Tacotron2 ConvNorm requires an odd kernel_size"
    pad = (K - 1) // 2
    Tpad = T + K - 1
    out_dtype = x_bct.dtype if out_dtype is None else out_dtype

    # ---- JAX glue: layout conversion + weight fusion (no im2col in HBM) ----
    x_btc = jnp.transpose(x_bct, (0, 2, 1))                   # (B, T, C_in)
    x_pad = jnp.pad(x_btc, ((0, 0), (pad, pad), (0, 0)))      # (B, Tpad, C_in)

    conv_w_kcf = jnp.transpose(conv_w_fck, (2, 1, 0))         # (K, C_in, F)
    dense_w_fd = jnp.transpose(dense_w_df, (1, 0))            # (F, D)
    w_fused = jnp.einsum("kcf,fd->kcd", conv_w_kcf,
                         dense_w_fd).reshape(K * C_in, D)     # (K*C_in, D)

    # ---- Row (time) tile selection ----
    if 0 < time_tile < T and (T % time_tile == 0) and (time_tile % 8 == 0):
        TT = time_tile
    else:
        TT = T                      # single time tile (test-sized / ragged T)
    grid = (B, T // TT)

    # ---- VMEM accounting (narrow minor axes pad to 128 lanes in VMEM) ----
    in_item = jnp.dtype(x_bct.dtype).itemsize
    out_item = jnp.dtype(out_dtype).itemsize
    in_block = _round_up(Tpad, 8) * 128 * in_item                 # C_in -> 128 lanes
    w_block = _round_up(K * C_in, 8) * _round_up(D, 128) * 4
    out_block = _round_up(TT, 8) * _round_up(D, 128) * out_item
    slice_tmp = K * _round_up(TT, 8) * 128 * 4                    # K shifted windows
    panel_tmp = _round_up(TT, 8) * _round_up(K * C_in, 128) * 4
    acc_tmp = _round_up(TT, 8) * _round_up(D, 128) * 4
    vmem_limit = (2 * (in_block + w_block + out_block)
                  + slice_tmp + panel_tmp + acc_tmp + (4 << 20))
    vmem_limit = min(max(vmem_limit, 8 << 20), 64 << 20)          # v7x physical VMEM

    kernel = functools.partial(_location_kernel, K=K, TT=TT)

    out = pl.pallas_call(
        kernel,
        out_shape=jax.ShapeDtypeStruct((B, T, D), out_dtype),
        grid=grid,
        in_specs=[
            # whole padded time extent per batch element; constant over the
            # time-tile axis so it is DMA'd once per batch element.
            pl.BlockSpec((None, Tpad, C_in), lambda b, t: (b, 0, 0)),
            # fused weight: constant over the whole grid -> resident.
            pl.BlockSpec((K * C_in, D), lambda b, t: (0, 0)),
        ],
        out_specs=pl.BlockSpec((None, TT, D), lambda b, t: (b, t, 0)),
        compiler_params=pltpu.CompilerParams(
            dimension_semantics=("parallel", "parallel"),
            vmem_limit_bytes=int(vmem_limit),
        ),
    )(x_pad, w_fused)

    # TODO(synk): for attention_dim < 128, pack 128 // D output rows per lane
    # row (wrapper-side reshape) so the dominant HBM store stays lane-dense.
    return out


if __name__ == "__main__":
    # Small shapes consistent with LocationLayer.forward (D=128 is the real
    # Tacotron2 attention_dim and keeps the output lane-dense).
    B, T = 2, 32
    C_in = 2                       # attention_weights_cat channels
    attention_n_filters = 8
    attention_kernel_size = 5
    attention_dim = 128

    key = jax.random.PRNGKey(0)
    k_x, k_cw, k_dw = jax.random.split(key, 3)

    # attention_weights_cat: (B, 2, T) (NCW, like the PyTorch module expects)
    x = jax.random.normal(k_x, (B, C_in, T), dtype=jnp.float32)
    # ConvNorm weight: (out_channels=F, in_channels=2, kernel_size=K), bias=False
    conv_w = jax.random.normal(
        k_cw, (attention_n_filters, C_in, attention_kernel_size),
        dtype=jnp.float32) * 0.1
    # LinearNorm weight: (attention_dim, attention_n_filters), bias=False
    dense_w = jax.random.normal(
        k_dw, (attention_dim, attention_n_filters), dtype=jnp.float32) * 0.1

    out = location_layer_forward(x, conv_w, dense_w)
    out = jax.block_until_ready(out)

    # Pure-JAX reference (same math as PyTorch conv1d + transpose + linear),
    # computed WITHOUT weight fusion / panel build so both are validated.
    pad = (attention_kernel_size - 1) // 2
    x_btc = jnp.transpose(x, (0, 2, 1))
    x_padded = jnp.pad(x_btc, ((0, 0), (pad, pad), (0, 0)))
    windows = jnp.stack(
        [x_padded[:, k:k + T, :] for k in range(attention_kernel_size)], axis=0)
    conv_w_kcf = jnp.transpose(conv_w, (2, 1, 0))
    ref_conv = jnp.einsum("kbtc,kcf->btf", windows, conv_w_kcf)
    ref = jnp.einsum("btf,df->btd", ref_conv, dense_w)

    assert out.shape == (B, T, attention_dim)
    assert jnp.allclose(out, ref, atol=1e-5, rtol=1e-5)
    print("KERNEL_OK")
</pallas_src>

<mosaic_0001>
module attributes {stable_mosaic.version = 11 : i64} {
  func.func @_location_kernel(%arg0: i32, %arg1: i32, %arg2: memref<1x36x2xf32, #tpu.memory_space<vmem>>, %arg3: memref<10x128xf32, #tpu.memory_space<vmem>>, %arg4: memref<1x32x128xf32, #tpu.memory_space<vmem>>) attributes {dimension_semantics = [#tpu.dimension_semantics<parallel>, #tpu.dimension_semantics<parallel>], iteration_bounds = array<i64: 2, 1>, scalar_prefetch = 0 : i64, scratch_operands = 0 : i64, tpu.core_type = #tpu.core_type<tc>, window_params = [{transform_indices = @transform_0, window_bounds = array<i64: 1, 36, 2>}, {pipeline_mode = #tpu.pipeline_mode<synchronous>, transform_indices = @transform_1, window_bounds = array<i64: 10, 128>}, {transform_indices = @transform_2, window_bounds = array<i64: 1, 32, 128>}]} {
    %c32_i32 = arith.constant 32 : i32
    %0 = arith.muli %arg1, %c32_i32 : i32
    %1 = tpu.assume_multiple %0, 8 : i32
    %c0_i32 = arith.constant 0 : i32
    %2 = arith.addi %1, %c0_i32 : i32
    %c0 = arith.constant 0 : index
    %3 = arith.index_cast %2 : i32 to index
    %c0_0 = arith.constant 0 : index
    %4 = vector.load %arg2[%c0, %3, %c0_0] : memref<1x36x2xf32, #tpu.memory_space<vmem>>, vector<1x32x2xf32>
    %5 = vector.shape_cast %4 : vector<1x32x2xf32> to vector<32x2xf32>
    %c1_i32 = arith.constant 1 : i32
    %6 = arith.addi %1, %c1_i32 : i32
    %c0_1 = arith.constant 0 : index
    %7 = arith.index_cast %6 : i32 to index
    %c0_2 = arith.constant 0 : index
    %8 = vector.load %arg2[%c0_1, %7, %c0_2] : memref<1x36x2xf32, #tpu.memory_space<vmem>>, vector<1x32x2xf32>
    %9 = vector.shape_cast %8 : vector<1x32x2xf32> to vector<32x2xf32>
    %c2_i32 = arith.constant 2 : i32
    %10 = arith.addi %1, %c2_i32 : i32
    %c0_3 = arith.constant 0 : index
    %11 = arith.index_cast %10 : i32 to index
    %c0_4 = arith.constant 0 : index
    %12 = vector.load %arg2[%c0_3, %11, %c0_4] : memref<1x36x2xf32, #tpu.memory_space<vmem>>, vector<1x32x2xf32>
    %13 = vector.shape_cast %12 : vector<1x32x2xf32> to vector<32x2xf32>
    %c3_i32 = arith.constant 3 : i32
    %14 = arith.addi %1, %c3_i32 : i32
    %c0_5 = arith.constant 0 : index
    %15 = arith.index_cast %14 : i32 to index
    %c0_6 = arith.constant 0 : index
    %16 = vector.load %arg2[%c0_5, %15, %c0_6] : memref<1x36x2xf32, #tpu.memory_space<vmem>>, vector<1x32x2xf32>
    %17 = vector.shape_cast %16 : vector<1x32x2xf32> to vector<32x2xf32>
    %c4_i32 = arith.constant 4 : i32
    %18 = arith.addi %1, %c4_i32 : i32
    %c0_7 = arith.constant 0 : index
    %19 = arith.index_cast %18 : i32 to index
    %c0_8 = arith.constant 0 : index
    %20 = vector.load %arg2[%c0_7, %19, %c0_8] : memref<1x36x2xf32, #tpu.memory_space<vmem>>, vector<1x32x2xf32>
    %21 = vector.shape_cast %20 : vector<1x32x2xf32> to vector<32x2xf32>
    %22 = tpu.concatenate %5, %9, %13, %17, %21 in 1 : vector<32x2xf32>, vector<32x2xf32>, vector<32x2xf32>, vector<32x2xf32>, vector<32x2xf32> -> vector<32x10xf32>
    %c0_9 = arith.constant 0 : index
    %c0_10 = arith.constant 0 : index
    %23 = vector.load %arg3[%c0_9, %c0_10] : memref<10x128xf32, #tpu.memory_space<vmem>>, vector<10x128xf32>
    %cst = arith.constant dense<0.000000e+00> : vector<32x128xf32>
    %24 = tpu.matmul %22, %23, %cst {dimension_numbers = #tpu.dot_dimension_numbers<[1], [0], [0], [1], [0, 0, 1, 1], [], []>} : vector<32x10xf32>, vector<10x128xf32>, vector<32x128xf32> -> vector<32x128xf32>
    %c0_11 = arith.constant 0 : index
    %c0_12 = arith.constant 0 : index
    %c0_13 = arith.constant 0 : index
    %25 = vector.load %arg4[%c0_11, %c0_12, %c0_13] : memref<1x32x128xf32, #tpu.memory_space<vmem>>, vector<1x32x128xf32>
    %26 = vector.shape_cast %25 : vector<1x32x128xf32> to vector<32x128xf32>
    %27 = vector.shape_cast %24 : vector<32x128xf32> to vector<1x32x128xf32>
    tpu.vector_store %arg4[%c0_11, %c0_12, %c0_13], %27 {strides = array<i32>} : memref<1x32x128xf32, #tpu.memory_space<vmem>>, vector<1x32x128xf32>,
    return
  }
  func.func @transform_0(%arg0: i32, %arg1: i32) -> (i32, i32, i32) {
    %c0_i32 = arith.constant 0 : i32
    %c0_i32_0 = arith.constant 0 : i32
    %c0_i32_1 = arith.constant 0 : i32
    return %arg0, %c0_i32, %c0_i32_0 : i32, i32, i32
  }
  func.func @transform_1(%arg0: i32, %arg1: i32) -> (i32, i32) {
    %c0_i32 = arith.constant 0 : i32
    %c0_i32_0 = arith.constant 0 : i32
    %c0_i32_1 = arith.constant 0 : i32
    return %c0_i32, %c0_i32_0 : i32, i32
  }
  func.func @transform_2(%arg0: i32, %arg1: i32) -> (i32, i32, i32) {
    %c0_i32 = arith.constant 0 : i32
    %c0_i32_0 = arith.constant 0 : i32
    return %arg0, %arg1, %c0_i32 : i32, i32, i32
  }
}

</mosaic_0001>

<bundles_post_ra>
// kernel: tpu_custom_call.1
= control target key start
LH: loop header
LB: loop body
LE: loop exit
PB: predicated region body
PF: predicated region fallthrough
CT: control target
= control target key end

     0   :  { %7 = vsyncpa [#allocation3], 0  ;;  %s872_s0 = inlined_call_operand.vmem [shape: f32[2,36,2], index: 0, kind: input, shape index: {}]   ;;  %s873_s1 = inlined_call_operand.vmem [shape: f32[10,128], index: 1, kind: input, shape index: {}]   ;;  %s874_s2 = inlined_call_operand.hbm [shape: f32[2,32,128], index: 2, kind: output, shape index: {}]  }
   0x1   :  { %9 = vsyncpa [#allocation3 + $0x1], 0  ;;  %s704_s9 = smov 0   ;;  %s706_s10 = smov 0  }
   0x2   :  { %s708_s11 = smov 0   ;;  %s710_s12 = smov 0  }
   0x3   :  { %s712_s13 = smov 0   ;;  %s714_s14 = smov 0  }
   0x4 LB: > { %s482_s15 = sadd.s32 4294967295, %s680_s14   ;;  %s483_s16 = sadd.s32 4294967294, %s680_s14   ;;  %s680_s14 = sphi %s714_s14, %s15_s14   ;;  %s676_s13 = sphi %s712_s13, %s881_s13   ;;  %s672_s12 = sphi %s710_s12, %s880_s12   ;;  %s668_s11 = sphi %s708_s11, %s879_s11   ;;  %s664_s10 = sphi %s706_s10, %s878_s10   ;;  %s660_s9 = sphi %s704_s9, %s877_s9  }
   0x5   : > { %s27_s17 = sadd.s32 1, %s676_s13  ;;  %s83_s18 = sadd.s32 1, %s668_s11 }
   0x6   : > { %p29_p0 = scmp.ge.s32.totalorder %s27_s17, 2  ;;  %p93_p1 = scmp.ne.s32.totalorder %s668_s11, %s664_s10 }
   0x7   : > { %p94_p2 = scmp.eq.s32.totalorder %s482_s15, 1  ;;  %p99_p3 = scmp.ne.s32.totalorder %s664_s10, %s660_s9 }
   0x8   : > { %s883_s17 = smov (%p29_p0, %s27_s17), 0  ;;  %p100_p5 = scmp.eq.s32.totalorder %s483_s16, 1 }
   0x9   : > { %p744_p4 = por %p94_p2, %p93_p1  ;;  %s78_s20 = ssub.s32 %s676_s13, %s883_s17 }
   0xa   : > { %p486_p6 = scmp.ge.s32.totalorder %s680_s14, 1  ;;  %p81_p7 = scmp.eq.s32.totalorder %s78_s20, 0 }
   0xb   : > { %p751_p8 = por %p100_p5, %p99_p3  ;;  %p129_p9 = scmp.lt.s32.totalorder %s680_s14, 3 }
   0xc   : > { %s757_s22 = scalar_select %p81_p7, %s668_s11, %s83_s18  }
   0xd   : > { %p130_p10 = pnand %p486_p6, %p129_p9 }
   0xe   : > { %p151_p11 = scmp.lt.s32.totalorder (!%p130_p10), %s672_s12, 1  ;;  %s682_s28 = smov (!%p130_p10), 2   ;;  %v271_v8 = vld [vmem:[%s873_s1] sm:$0xff] (!%p130_p10)  ;;  %v272_v9 = vld [vmem:[%s873_s1 + $0x8] sm:$0x3] (!%p130_p10)  ;;  %vm286_vm0 = vcmask (!%p130_p10), 1041408  }
   0xf   : > { %133 = sbr.rel (%p130_p10) target bundleno = 400 (0x190), region = 28  ;;  %s683_s29 = smov (!%p130_p10), 4   ;;  %v532_v10 = vpack.c.bf16 (!%p130_p10), %v272_v9, %v271_v8  ;;  %vm684_vm1 = vmmov (!%p130_p10), 1   ;;  %vm251_vm3 = vcmask (!%p130_p10), 15360   ;;  %vm256_vm4 = vcmask (!%p130_p10), 31744  }
  0x10   : > { %vm533_vm2 = vmpackc.low (!%p130_p10), %vm286_vm0, %vm684_vm1  ;;  %s685_s6 = smov (!%p130_p10), 6   ;;  %s686_s7 = smov (!%p130_p10), 8   ;;  %vm261_vm5 = vcmask (!%p130_p10), 48128   ;;  %vm266_vm6 = vcmask (!%p130_p10), 64512   ;;  %vm273_vm7 = vcmask (!%p130_p10), 80896  }
  0x11   : > { %534 = vmatprep.subr.msk.bf16.mxu0 (!%p130_p10), %vm533_vm2, %v532_v10  ;;  %538 = vmatprep.subr.msk.bf16.mxu1 (!%p130_p10), %vm533_vm2, %v532_v10  ;;  %s148_s8 = sand.u32 (!%p130_p10), 1, %s664_s10   ;;  %s515_s20 = sshll.u32 (!%p130_p10), %s672_s12, 9 }
  0x12   : > { %537 = vmatpush3.bf16.msk.msra.mxu0 (!%p130_p10), %vm533_vm2, %v532_v10  ;;  %539 = vmatpush3.bf16.msk.msra.mxu1 (!%p130_p10), %vm533_vm2, %v532_v10  ;;  %s487_s15 = sshll.u32 (!%p130_p10), %s148_s8, 5  ;;  %s823_s25 = scalar_lea.hbm (!%p130_p10), %s874_s2, %s515_s20 }
  0x13   : > { %s150_s16 = scalar_lea.vmem (!%p130_p10), [#allocation2], %s487_s15  ;;  %s825_s26 = scalar_lea.sflag (!%p130_p10), [#allocation3], %s148_s8 }
  0x14   : > { %s395_s18 = sshll.u32 (!%p130_p10), %s150_s16, 4  ;;  %s818_s18 = int_to_ptr.vmem [resolvable:$true] %s395_s18 }
  0x16   : > { %s152_s23 = scalar_select %p151_p11, %s672_s12, 1 }
  0x17   : > { %s602_s12 = scalar_lea.vmem %s818_s18, 512 }
  0x18   : > { %s540_s24 = smul.u32 40, %s152_s23  ;;  %p603_p12 = scmp.ne.s32.totalorder %s818_s18, %s602_s12 }
  0x1a   : > { %s764_s27 = scalar_lea.vmem %s872_s0, %s540_s24  ;;  %p604_p13 = pnand %p603_p12, %p744_p4 }
  0x1b   : > { %v490_v0 = vld [vmem:[%s764_s27 + $0x9] sm:$0xff]  ;;  %v489_v1 = vld [vmem:[%s764_s27 + $0x1] sm:$0xff]  ;;  %v492_v2 = vld [vmem:[%s764_s27 + $0x19] sm:$0xff] }
  0x1c   : > { %193 = vrot.lane.b32.xlu1 %v490_v0, %s682_s28  ;;  %191 = vrot.lane.b32.xlu0 %v489_v1, %s682_s28  ;;  %v491_v3 = vld [vmem:[%s764_s27 + $0x11] sm:$0xff]  ;;  %v493_v5 = vld [vmem:[%s764_s27 + $0x2] sm:$0xff]  ;;  %p605_p0 = pneg %p604_p13 }
  0x1d   : > { %v495_v4 = vld [vmem:[%s764_s27 + $0x12] sm:$0xff]  ;;  %v496_v6 = vld [vmem:[%s764_s27 + $0x1a] sm:$0xff]  ;;  %v494_v7 = vld [vmem:[%s764_s27 + $0xa] sm:$0xff] }
  0x1e   : > { %v499_v11 = vld [vmem:[%s764_s27 + $0x13] sm:$0xff]  ;;  %v497_v12 = vld [vmem:[%s764_s27 + $0x3] sm:$0xff]  ;;  %v500_v13 = vld [vmem:[%s764_s27 + $0x1b] sm:$0xff] }
  0x1f   : > { %v498_v14 = vld [vmem:[%s764_s27 + $0xb] sm:$0xff]  ;;  %v503_v15 = vld [vmem:[%s764_s27 + $0x14] sm:$0xff]  ;;  %v504_v17 = vld [vmem:[%s764_s27 + $0x1c] sm:$0xff] }
  0x20   : > { %197 = vrot.lane.b32.xlu1 %v492_v2, %s682_s28  ;;  %195 = vrot.lane.b32.xlu0 %v491_v3, %s682_s28  ;;  %v501_v16 = vld [vmem:[%s764_s27 + $0x4] sm:$0xff]  ;;  %v502_v18 = vld [vmem:[%s764_s27 + $0xc] sm:$0xff] }
  0x21   : > { %v159_v29 = vld [vmem:[%s764_s27] sm:$0xff]  ;;  %v161_v30 = vld [vmem:[%s764_s27 + $0x10] sm:$0xff]  ;;  %v160_v35 = vld [vmem:[%s764_s27 + $0x8] sm:$0xff] }
  0x22   : > { %v162_v36 = vld [vmem:[%s764_s27 + $0x18] sm:$0xff]  ;;  %s687_s27 = smov [#allocation2]  }
  0x23   : > { %s606_s28 = sshll.u32 %s687_s27, 4  ;;  %s607_s28 = int_to_ptr.vmem [resolvable:$false] %s606_s28 }
  0x24   : > { %211 = vrot.lane.b32.xlu1 %v495_v4, %s683_s29  ;;  %207 = vrot.lane.b32.xlu0 %v493_v5, %s683_s29  ;;  %p609_p1 = scmp.lt.s32.totalorder %s818_s18, %s607_s28 }
  0x28   : > { %213 = vrot.lane.b32.xlu1 %v496_v6, %s683_s29  ;;  %209 = vrot.lane.b32.xlu0 %v494_v7, %s683_s29  ;;  %s608_s29 = scalar_lea.vmem %s607_s28, 1024 }
  0x29   : > { %p610_p2 = scmp.lt.s32.totalorder %s608_s29, %s602_s12 }
  0x2b   : > { %p611_p3 = por %p610_p2, %p609_p1 }
  0x2c   : > { %227 = vrot.lane.b32.xlu1 %v499_v11, %s685_s6  ;;  %223 = vrot.lane.b32.xlu0 %v497_v12, %s685_s6 }
  0x2d   : > { %p612_p5 = pnand %p611_p3, %p605_p0 }
  0x30   : > { %229 = vrot.lane.b32.xlu1 %v500_v13, %s685_s6  ;;  %225 = vrot.lane.b32.xlu0 %v498_v14, %s685_s6 }
  0x34   : > { %243 = vrot.lane.b32.xlu1 %v503_v15, %s686_s7  ;;  %239 = vrot.lane.b32.xlu0 %v501_v16, %s686_s7 }
  0x38   : > { %245 = vrot.lane.b32.xlu1 %v504_v17, %s686_s7  ;;  %241 = vrot.lane.b32.xlu0 %v502_v18, %s686_s7 }
  0x8e   : > { %v194_v19 = vpop.permute.xlu1 %193  ;;  %v192_v20 = vpop.permute.xlu0 %191 }
  0x8f   : > { %v252_v33 = vsel %vm251_vm3, %v159_v29, %v192_v20  ;;  %v253_v45 = vsel %vm251_vm3, %v160_v35, %v194_v19 }
  0x92   : > { %v198_v21 = vpop.permute.xlu1 %197  ;;  %v196_v22 = vpop.permute.xlu0 %195 }
  0x93   : > { %v254_v34 = vsel %vm251_vm3, %v161_v30, %v196_v22  ;;  %v255_v46 = vsel %vm251_vm3, %v162_v36, %v198_v21 }
  0x96   : > { %v212_v23 = vpop.permute.xlu1 %211  ;;  %v208_v24 = vpop.permute.xlu0 %207 }
  0x97   : > { %v259_v37 = vsel %vm256_vm4, %v254_v34, %v212_v23  ;;  %v257_v38 = vsel %vm256_vm4, %v252_v33, %v208_v24 }
  0x9a   : > { %v214_v25 = vpop.permute.xlu1 %213  ;;  %v210_v26 = vpop.permute.xlu0 %209 }
  0x9b   : > { %v260_v47 = vsel %vm256_vm4, %v255_v46, %v214_v25  ;;  %v258_v48 = vsel %vm256_vm4, %v253_v45, %v210_v26 }
  0x9e   : > { %v228_v27 = vpop.permute.xlu1 %227  ;;  %v224_v28 = vpop.permute.xlu0 %223 }
  0x9f   : > { %v264_v39 = vsel %vm261_vm5, %v259_v37, %v228_v27  ;;  %v262_v40 = vsel %vm261_vm5, %v257_v38, %v224_v28 }
  0xa2   : > { %v230_v31 = vpop.permute.xlu1 %229  ;;  %v226_v32 = vpop.permute.xlu0 %225 }
  0xa3   : > { %v265_v49 = vsel %vm261_vm5, %v260_v47, %v230_v31  ;;  %v263_v50 = vsel %vm261_vm5, %v258_v48, %v226_v32 }
  0xa6   : > { %v244_v41 = vpop.permute.xlu1 %243  ;;  %v240_v42 = vpop.permute.xlu0 %239 }
  0xa7   : > { %v267_v43 = vsel %vm266_vm6, %v262_v40, %v240_v42  ;;  %v269_v44 = vsel %vm266_vm6, %v264_v39, %v244_v41 }
  0xa8   : > { %526 = vmatprep.mubr.msk.f32.mxu0 %vm273_vm7, %v267_v43  ;;  %529 = vmatprep.mubr.msk.f32.mxu1 %vm273_vm7, %v269_v44 }
  0xaa   : > { %v246_v51 = vpop.permute.xlu1 %245  ;;  %v242_v52 = vpop.permute.xlu0 %241 }
  0xab   : > { %v270_v53 = vsel %vm266_vm6, %v265_v49, %v246_v51  ;;  %v268_v54 = vsel %vm266_vm6, %v263_v50, %v242_v52 }
  0xac   : > { %527 = vmatmul.mubr.msk.f32.vlgmr.msra.gmra.mrb[0].mxu0 %vm273_vm7, %v268_v54  ;;  %530 = vmatmul.mubr.msk.f32.vlgmr.msra.gmra.mrb[0].mxu1 %vm273_vm7, %v270_v53 }
 0x17f   : > { %v528_v55 = vpop.f32.mrb[0].mxu0  ;;  %v531_v56 = vpop.f32.mrb[0].mxu1 }
 0x180   : > { %376 = vst [vmem:[%s150_s16 + $0x8] sm:$0xff] %v528_v55  ;;  %378 = vst [vmem:[%s150_s16 + $0x18] sm:$0xff] %v531_v56  ;;  %v356_v57 = vpop.f32.mrb[1].mxu0  ;;  %v366_v58 = vpop.f32.mrb[1].mxu1 }
 0x181   : > { %375 = vst [vmem:[%s150_s16] sm:$0xff] %v356_v57  ;;  %377 = vst [vmem:[%s150_s16 + $0x10] sm:$0xff] %v366_v58 }
 0x182   : > { %615 = shalt.err (!%p612_p5)
}
 0x183   : > { %s616_s30 = scalar_lea.hbm %s823_s25, 512  ;;  %s620_s5 = scalar_lea.hbm %s874_s2, 1024 }
 0x184   : > { %p617_p6 = scmp.ne.s32.totalorder %s823_s25, %s616_s30  ;;  %p621_p10 = scmp.lt.u32.totalorder %s823_s25, %s874_s2 }
 0x185   : > { %p622_p11 = scmp.lt.u32.totalorder %s620_s5, %s616_s30  ;;  %p624_p13 = scmp.lt.u32.totalorder %s616_s30, %s823_s25 }
 0x186   : > { %p618_p7 = pnand %p617_p6, %p744_p4 }
 0x187   : > { %p623_p12 = por %p622_p11, %p621_p10 }
 0x188   : > { %p619_p9 = pneg %p618_p7 }
 0x189   : > { %p625_p0 = por %p624_p13, %p623_p12 }
 0x18b   : > { %p626_p1 = pnand %p625_p0, %p619_p9 }
 0x18d   : > { %629 = shalt.err (!%p626_p1)
}
 0x18e   : > { %s688_s15 = smov 128  }
 0x18f   : > { %541 = dma.vmem_to_hbm [thread:$0]  (%p744_p4), %s818_s18, 512, %s823_s25, %s825_s26, %s688_s15, %s688_s15, %s686_s7  }
 0x190 PF: > { %p547_p2 = scmp.ge.s32.totalorder %s680_s14, 2  ;;  %s410_s16 = sand.u32 1, %s660_s9  }
 0x191   : > { %s411_s20 = scalar_lea.sflag [#allocation3], %s410_s16 }
 0x192   : > { %p544_p3 = pnand %p547_p2, %p751_p8 }
 0x194   : > { %655 = dma.done.wait (!%p544_p3), %s411_s20, 512  }
 0x195   : > { %657 = vsyncadd (!%p544_p3), %s411_s20, 4294966784  ;;  %s15_s14 = sadd.s32 1, %s680_s14   ;;  %s877_s9 = smov %s664_s10 }
 0x196   : > { %p12_p5 = scmp.ge.s32.totalorder %s15_s14, 4   ;;  %s878_s10 = smov %s668_s11 }
 0x197   : > { %s879_s11 = smov %s757_s22  ;;  %s880_s12 = smov %s676_s13 }
 0x198   : > { %s881_s13 = smov %s883_s17  ;;  %14 = sbr.rel (!%p12_p5) target bundleno = 4 (0x4), region = 68 }
 0x19f   :  { %416 = vsyncpa [#allocation3], 1 }
 0x1a0   :  { %418 = vsyncpa [#allocation3 + $0x1], 1 }

</bundles_post_ra>
